<compile_context>
chip_gen: v7x
topology: tpu7x:2x2x1
jax: 0.10.0
libtpu: 0.0.40
codegen_flags: <defaults>
</compile_context>

<pallas_src>
import jax
import jax.numpy as jnp
from jax.experimental import pallas as pl
from jax.experimental.pallas import tpu as pltpu

K = 3                 # conv kernel size
PAD = 1               # 'same' padding for stride-1 3x3
LANE = 128            # TPU lane width
MAX_IMG_PER_STEP = 8  # per-step VMEM at 16x16x4: ~0.5 MB bf16 patches (x2 buffers)
                      # + ~1 MB f32 conv intermediate -> fits even v5e's 16 MiB scoped VMEM


def _round_up(x, m):
    return ((x + m - 1) // m) * m


# ----------------------------- fused Pallas kernel ---------------------------

def _fused_kernel(p_ref, wc_ref, bc_ref, pool_ref, wl_ref, bl_ref, o_ref):
    # p_ref    : (IMG*HW, K*K*C_IN) bf16  im2col patches for IMG images (row = img*HW + y*W + x)
    # wc_ref   : (K*K*C_IN, C_OUT)  bf16  conv weight, tap-major rows ((ky*K+kx)*C_IN + ci)
    # bc_ref   : (1, C_OUT)         f32   conv bias
    # pool_ref : (IMG, IMG*HW)      f32   block-diagonal mean-pool matrix (1/HW folded in)
    # wl_ref   : (C_OUT, N_PAD)     bf16  concatenated converter weights, zero-padded to 128 lanes
    # bl_ref   : (1, N_PAD)         f32   concatenated converter biases, zero-padded
    # o_ref    : (1, IMG, N_PAD)    f32   packed converter outputs for these IMG images

    # Conv as one bf16 MXU matmul (f32 accumulation), + bias, ReLU.
    conv = jnp.dot(p_ref[...], wc_ref[...],
                   preferred_element_type=jnp.float32)            # (IMG*HW, C_OUT)
    conv = jnp.maximum(conv + bc_ref[...], 0.0)

    # Global average pool as an MXU matmul (scale 1/HW already folded into pool_ref).
    pooled = jnp.dot(pool_ref[...], conv,
                     preferred_element_type=jnp.float32)          # (IMG, C_OUT)

    # Both feature converters fused: one bf16 matmul against lane-padded weights.
    out = jnp.dot(pooled.astype(wl_ref.dtype), wl_ref[...],
                  preferred_element_type=jnp.float32) + bl_ref[...]
    o_ref[0] = out.astype(o_ref.dtype)                            # (IMG, N_PAD)


def _fused_pipe_call(patches, wc, bc, pool, wl, bl, *,
                     n_steps, img, hw, c_out, n_pad, kd):
    cost = pl.CostEstimate(
        flops=(2 * n_steps * img * hw * kd * c_out        # conv matmul
               + 2 * n_steps * img * img * hw * c_out     # pool matmul
               + 2 * n_steps * img * c_out * n_pad),      # converters
        transcendentals=0,
        bytes_accessed=(2 * patches.size + 2 * wc.size + 2 * wl.size
                        + 4 * (bc.size + bl.size + pool.size + n_steps * img * n_pad)),
    )
    out = pl.pallas_call(
        _fused_kernel,
        out_shape=jax.ShapeDtypeStruct((n_steps, img, n_pad), jnp.float32),
        grid=(n_steps,),                                   # independent image groups
        in_specs=[
            pl.BlockSpec((img * hw, kd), lambda s: (s, 0)),    # this step's patch slab
            pl.BlockSpec((kd, c_out), lambda s: (0, 0)),       # resident conv weight
            pl.BlockSpec((1, c_out), lambda s: (0, 0)),        # resident conv bias
            pl.BlockSpec((img, img * hw), lambda s: (0, 0)),   # resident pool matrix
            pl.BlockSpec((c_out, n_pad), lambda s: (0, 0)),    # resident converter W
            pl.BlockSpec((1, n_pad), lambda s: (0, 0)),        # resident converter b
        ],
        out_specs=pl.BlockSpec((1, img, n_pad), lambda s: (s, 0, 0)),  # lane-dense block
        compiler_params=pltpu.CompilerParams(
            dimension_semantics=("parallel",)),            # both TCs on v7x take steps
        cost_estimate=cost,
    )(patches, wc, bc, pool, wl, bl)
    return out.reshape(n_steps * img, n_pad)


@jax.jit
def _pipe_forward(video_nchw, wc, bc, wl, bl):
    """NCHW video -> packed (B, N_PAD) converter outputs.  All glue fused under jit."""
    B, c_in, H, W = video_nchw.shape
    kd, c_out = wc.shape
    n_pad = wl.shape[1]
    hw = H * W

    # Keep >= 2 "parallel" grid steps when B >= 2 (v7x has 2 TensorCores), but batch
    # as many images per step as possible (per-step overhead dominates at 16x16).
    n_steps = max(min(B, 2), -(-B // MAX_IMG_PER_STEP))
    img = -(-B // n_steps)                 # images per grid step
    b_pad = n_steps * img

    # NCHW -> NHWC, zero halo for 'same' 3x3, zero phantom images to fill the last step.
    x = jnp.transpose(video_nchw, (0, 2, 3, 1))
    x = jnp.pad(x, ((0, b_pad - B), (PAD, PAD), (PAD, PAD), (0, 0)))

    # im2col in XLA: 9 shifted views concatenated on the channel axis (tap-major),
    # so the kernel sees a lane-dense patch slab (~37 KB/image of extra HBM).
    taps = [x[:, ky:ky + H, kx:kx + W, :] for ky in range(K) for kx in range(K)]
    patches = jnp.concatenate(taps, axis=-1).reshape(b_pad * hw, kd)
    patches = patches.astype(jnp.bfloat16)

    # Block-diagonal mean-pool matrix (pooled = P @ conv) with 1/HW folded in.
    pool = jnp.repeat(jnp.eye(img, dtype=jnp.float32), hw, axis=1) * (1.0 / hw)

    packed = _fused_pipe_call(patches, wc, bc, pool, wl, bl,
                              n_steps=n_steps, img=img, hw=hw,
                              c_out=c_out, n_pad=n_pad, kd=kd)
    return packed[:B]


# ----------------------------- modules ---------------------------------------

class FeatureExtractor:
    """Conv3x3(pad=1) + ReLU + global average pool.  Parameter container + preprocess;
    the hot path runs inside the fused Pallas kernel (standalone __call__ reuses the
    same kernel with an identity 'converter')."""

    expected_frame_size = (16, 16)
    fps = 30
    step_size = 1

    def __init__(self, key, c_in, c_out, k=3):
        assert k == K
        k1, k2 = jax.random.split(key)
        fan_in = c_in * k * k
        bound = 1.0 / float(fan_in) ** 0.5
        # PyTorch conv weight layout (Cout, Cin, K, K); kept in f32 for the reference check.
        self.w_nchw = jax.random.uniform(k1, (c_out, c_in, k, k),
                                         jnp.float32, -bound, bound)
        self.b = jax.random.uniform(k2, (c_out,), jnp.float32, -bound, bound)
        self.k = k
        self.c_in, self.c_out = c_in, c_out
        # im2col weight matrix (K*K*Cin, Cout), row = (ky*K+kx)*Cin + ci;
        # pre-cast to bf16 once (MXU operand).
        self.w_mat = jnp.transpose(self.w_nchw, (2, 3, 1, 0)).reshape(
            k * k * c_in, c_out).astype(jnp.bfloat16)
        self.b_row = self.b.reshape(1, c_out)                 # f32 bias row
        # Identity "converter" (lane-padded, bf16) so the extractor can run standalone
        # through the same fused kernel.
        n_pad = _round_up(max(c_out, LANE), LANE)
        self._w_id = jnp.pad(jnp.eye(c_out, dtype=jnp.float32),
                             ((0, 0), (0, n_pad - c_out))).astype(jnp.bfloat16)
        self._b_id = jnp.zeros((1, n_pad), jnp.float32)

    def __call__(self, video_nchw):
        out = _pipe_forward(video_nchw, self.w_mat, self.b_row, self._w_id, self._b_id)
        return out[:, :self.c_out]

    def preprocess(self, video):
        return video.astype(jnp.float32)


class FeatureConverter:
    """Linear layer.  Inside `Pipe` it is fused (concatenated, lane-padded, bf16-cast)
    into the single Pallas kernel; standalone __call__ is plain JAX for convenience."""

    def __init__(self, key, d_in, d_out):
        k1, k2 = jax.random.split(key)
        bound = 1.0 / float(d_in) ** 0.5
        self.w = jax.random.uniform(k1, (d_in, d_out), jnp.float32, -bound, bound)
        self.b = jax.random.uniform(k2, (d_out,), jnp.float32, -bound, bound)

    def __call__(self, feature):
        return feature @ self.w + self.b


class Pipe:
    """JAX/Pallas equivalent of the PyTorch Pipe: the whole forward
    (conv + ReLU + pool + converters) runs as ONE fused pallas_call."""

    def __init__(self, feature_extractor, feature_converter):
        self.feature_extractor = feature_extractor
        self.feature_converter = feature_converter

        converters = (feature_converter if isinstance(feature_converter, list)
                      else [feature_converter])
        self._out_dims = [int(c.w.shape[1]) for c in converters]
        n_out = sum(self._out_dims)
        n_pad = _round_up(max(n_out, LANE), LANE)
        wl = jnp.concatenate([c.w for c in converters], axis=1)     # (C_OUT, n_out)
        bl = jnp.concatenate([c.b for c in converters], axis=0)     # (n_out,)
        # Pack converter params to a lane-dense 128-wide slab once, at init (bf16 W).
        self._wl = jnp.pad(wl, ((0, 0), (0, n_pad - n_out))).astype(jnp.bfloat16)
        self._bl = jnp.pad(bl, (0, n_pad - n_out)).reshape(1, n_pad)

    def forward(self, video_tensor):
        packed = _pipe_forward(video_tensor, self.feature_extractor.w_mat,
                               self.feature_extractor.b_row, self._wl, self._bl)
        outs, off = [], 0
        for d in self._out_dims:
            outs.append(packed[:, off:off + d])
            off += d
        if isinstance(self.feature_converter, list):
            return outs
        return outs[0]

    __call__ = forward

    @property
    def expected_frame_size(self):
        return self.feature_extractor.expected_frame_size

    @property
    def fps(self):
        return self.feature_extractor.fps

    @property
    def step_size(self):
        return self.feature_extractor.step_size

    def preprocess(self, video):
        return self.feature_extractor.preprocess(video)


# ----------------------------- main -------------------------------------------

if __name__ == "__main__":
    key = jax.random.PRNGKey(0)
    k_x, k_fe, k_c1, k_c2 = jax.random.split(key, 4)

    B, C_IN, H, W = 2, 4, 16, 16
    C_OUT = 32

    x = jax.random.normal(k_x, (B, C_IN, H, W), jnp.float32)   # NCHW like PyTorch

    extractor = FeatureExtractor(k_fe, C_IN, C_OUT, k=3)
    converters = [FeatureConverter(k_c1, C_OUT, 16),
                  FeatureConverter(k_c2, C_OUT, 8)]
    pipe = Pipe(extractor, converters)

    outs = pipe(pipe.preprocess(x))
    outs = [jax.block_until_ready(o) for o in outs]

    assert outs[0].shape == (B, 16) and outs[1].shape == (B, 8)
    assert all(bool(jnp.all(jnp.isfinite(o))) for o in outs)

    # Correctness vs a plain-JAX f32 reference of the same synthetic net.
    # (bf16 MXU operands in the kernel -> loosened tolerance.)
    ref_feat = jnp.maximum(
        jax.lax.conv_general_dilated(
            x, extractor.w_nchw, (1, 1), "SAME",
            dimension_numbers=("NCHW", "OIHW", "NCHW"))
        + extractor.b.reshape(1, C_OUT, 1, 1), 0.0).mean(axis=(2, 3))
    ref_outs = [ref_feat @ c.w + c.b for c in converters]
    for o, r in zip(outs, ref_outs):
        assert jnp.allclose(o, r, atol=1e-2, rtol=1e-2), "mismatch vs reference"

    # Standalone extractor path (same fused kernel with an identity converter).
    feat = jax.block_until_ready(extractor(pipe.preprocess(x)))
    assert jnp.allclose(feat, ref_feat, atol=1e-2, rtol=1e-2), "extractor mismatch vs reference"

    print("KERNEL_OK")
</pallas_src>

<mosaic_0001>
module attributes {stable_mosaic.version = 11 : i64} {
  func.func @_fused_kernel(%arg0: i32, %arg1: memref<256x36xbf16, #tpu.memory_space<vmem>>, %arg2: memref<36x32xbf16, #tpu.memory_space<vmem>>, %arg3: memref<1x32xf32, #tpu.memory_space<vmem>>, %arg4: memref<1x256xf32, #tpu.memory_space<vmem>>, %arg5: memref<32x128xbf16, #tpu.memory_space<vmem>>, %arg6: memref<1x128xf32, #tpu.memory_space<vmem>>, %arg7: memref<1x1x128xf32, #tpu.memory_space<vmem>>) attributes {dimension_semantics = [#tpu.dimension_semantics<parallel>], iteration_bounds = array<i64: 2>, scalar_prefetch = 0 : i64, scratch_operands = 0 : i64, tpu.core_type = #tpu.core_type<tc>, window_params = [{transform_indices = @transform_0, window_bounds = array<i64: 256, 36>}, {pipeline_mode = #tpu.pipeline_mode<synchronous>, transform_indices = @transform_1, window_bounds = array<i64: 36, 32>}, {pipeline_mode = #tpu.pipeline_mode<synchronous>, transform_indices = @transform_2, window_bounds = array<i64: 1, 32>}, {pipeline_mode = #tpu.pipeline_mode<synchronous>, transform_indices = @transform_3, window_bounds = array<i64: 1, 256>}, {pipeline_mode = #tpu.pipeline_mode<synchronous>, transform_indices = @transform_4, window_bounds = array<i64: 32, 128>}, {pipeline_mode = #tpu.pipeline_mode<synchronous>, transform_indices = @transform_5, window_bounds = array<i64: 1, 128>}, {transform_indices = @transform_6, window_bounds = array<i64: 1, 1, 128>}]} {
    %c0 = arith.constant 0 : index
    %c0_0 = arith.constant 0 : index
    %0 = vector.load %arg1[%c0, %c0_0] : memref<256x36xbf16, #tpu.memory_space<vmem>>, vector<256x36xbf16>
    %c0_1 = arith.constant 0 : index
    %c0_2 = arith.constant 0 : index
    %1 = vector.load %arg2[%c0_1, %c0_2] : memref<36x32xbf16, #tpu.memory_space<vmem>>, vector<36x32xbf16>
    %cst = arith.constant dense<0.000000e+00> : vector<256x32xf32>
    %2 = tpu.matmul %0, %1, %cst {dimension_numbers = #tpu.dot_dimension_numbers<[1], [0], [0], [1], [0, 0, 1, 1], [], []>} : vector<256x36xbf16>, vector<36x32xbf16>, vector<256x32xf32> -> vector<256x32xf32>
    %c0_3 = arith.constant 0 : index
    %c0_4 = arith.constant 0 : index
    %3 = vector.load %arg3[%c0_3, %c0_4] : memref<1x32xf32, #tpu.memory_space<vmem>>, vector<1x32xf32>
    %4 = vector.broadcast %3 : vector<1x32xf32> to vector<256x32xf32>
    %5 = arith.addf %2, %4 : vector<256x32xf32>
    %cst_5 = arith.constant 0.000000e+00 : f32
    %6 = vector.broadcast %cst_5 : f32 to vector<256x32xf32>
    %7 = arith.maximumf %5, %6 : vector<256x32xf32>
    %c0_6 = arith.constant 0 : index
    %c0_7 = arith.constant 0 : index
    %8 = vector.load %arg4[%c0_6, %c0_7] : memref<1x256xf32, #tpu.memory_space<vmem>>, vector<1x256xf32>
    %cst_8 = arith.constant dense<0.000000e+00> : vector<1x32xf32>
    %9 = tpu.matmul %8, %7, %cst_8 {dimension_numbers = #tpu.dot_dimension_numbers<[1], [0], [0], [1], [0, 0, 1, 1], [], []>} : vector<1x256xf32>, vector<256x32xf32>, vector<1x32xf32> -> vector<1x32xf32>
    %10 = arith.truncf %9 : vector<1x32xf32> to vector<1x32xbf16>
    %c0_9 = arith.constant 0 : index
    %c0_10 = arith.constant 0 : index
    %11 = vector.load %arg5[%c0_9, %c0_10] : memref<32x128xbf16, #tpu.memory_space<vmem>>, vector<32x128xbf16>
    %cst_11 = arith.constant dense<0.000000e+00> : vector<1x128xf32>
    %12 = tpu.matmul %10, %11, %cst_11 {dimension_numbers = #tpu.dot_dimension_numbers<[1], [0], [0], [1], [0, 0, 1, 1], [], []>} : vector<1x32xbf16>, vector<32x128xbf16>, vector<1x128xf32> -> vector<1x128xf32>
    %c0_12 = arith.constant 0 : index
    %c0_13 = arith.constant 0 : index
    %13 = vector.load %arg6[%c0_12, %c0_13] : memref<1x128xf32, #tpu.memory_space<vmem>>, vector<1x128xf32>
    %14 = arith.addf %12, %13 : vector<1x128xf32>
    %c0_14 = arith.constant 0 : index
    %c0_15 = arith.constant 0 : index
    %c0_16 = arith.constant 0 : index
    %15 = vector.load %arg7[%c0_14, %c0_15, %c0_16] : memref<1x1x128xf32, #tpu.memory_space<vmem>>, vector<1x1x128xf32>
    %16 = vector.shape_cast %15 : vector<1x1x128xf32> to vector<1x128xf32>
    %17 = vector.shape_cast %14 : vector<1x128xf32> to vector<1x1x128xf32>
    tpu.vector_store %arg7[%c0_14, %c0_15, %c0_16], %17 {strides = array<i32>} : memref<1x1x128xf32, #tpu.memory_space<vmem>>, vector<1x1x128xf32>,
    return
  }
  func.func @transform_0(%arg0: i32) -> (i32, i32) {
    %c0_i32 = arith.constant 0 : i32
    %c0_i32_0 = arith.constant 0 : i32
    return %arg0, %c0_i32 : i32, i32
  }
  func.func @transform_1(%arg0: i32) -> (i32, i32) {
    %c0_i32 = arith.constant 0 : i32
    %c0_i32_0 = arith.constant 0 : i32
    %c0_i32_1 = arith.constant 0 : i32
    return %c0_i32, %c0_i32_0 : i32, i32
  }
  func.func @transform_2(%arg0: i32) -> (i32, i32) {
    %c0_i32 = arith.constant 0 : i32
    %c0_i32_0 = arith.constant 0 : i32
    %c0_i32_1 = arith.constant 0 : i32
    return %c0_i32, %c0_i32_0 : i32, i32
  }
  func.func @transform_3(%arg0: i32) -> (i32, i32) {
    %c0_i32 = arith.constant 0 : i32
    %c0_i32_0 = arith.constant 0 : i32
    %c0_i32_1 = arith.constant 0 : i32
    return %c0_i32, %c0_i32_0 : i32, i32
  }
  func.func @transform_4(%arg0: i32) -> (i32, i32) {
    %c0_i32 = arith.constant 0 : i32
    %c0_i32_0 = arith.constant 0 : i32
    %c0_i32_1 = arith.constant 0 : i32
    return %c0_i32, %c0_i32_0 : i32, i32
  }
  func.func @transform_5(%arg0: i32) -> (i32, i32) {
    %c0_i32 = arith.constant 0 : i32
    %c0_i32_0 = arith.constant 0 : i32
    %c0_i32_1 = arith.constant 0 : i32
    return %c0_i32, %c0_i32_0 : i32, i32
  }
  func.func @transform_6(%arg0: i32) -> (i32, i32, i32) {
    %c0_i32 = arith.constant 0 : i32
    %c0_i32_0 = arith.constant 0 : i32
    %c0_i32_1 = arith.constant 0 : i32
    return %arg0, %c0_i32, %c0_i32_0 : i32, i32, i32
  }
}

</mosaic_0001>

<bundles_post_ra>
// kernel: mul.1
= control target key start
LH: loop header
LB: loop body
LE: loop exit
PB: predicated region body
PF: predicated region fallthrough
CT: control target
= control target key end

     0   :  { %s26_s0 = inlined_call_operand.<no memory space> [shape: f32[], index: 0, kind: input, shape index: {}]   ;;  %s27_s1 = inlined_call_operand.vmem [shape: f32[1,256], index: 1, kind: output, shape index: {}]  }
   0x1   :  { %v2_v0 = vstv %s26_s0 }
   0x2   :  { %3 = vst [vmem:[%s27_s1] sm:$0x1] %v2_v0  ;;  %6 = vst [vmem:[%s27_s1 + $0x1] sm:$0x1] %v2_v0 }

// kernel: _pipe_forward.1
= control target key start
LH: loop header
LB: loop body
LE: loop exit
PB: predicated region body
PF: predicated region fallthrough
CT: control target
= control target key end

     0   :  { %11 = vsyncpa [#allocation3], 0  ;;  %s1416_s0 = inlined_call_operand.vmem [shape: bf16[512,36], index: 0, kind: input, shape index: {}]   ;;  %s1417_s1 = inlined_call_operand.vmem [shape: bf16[36,32], index: 1, kind: input, shape index: {}]   ;;  %s1418_s2 = inlined_call_operand.vmem [shape: f32[1,32], index: 2, kind: input, shape index: {}]   ;;  %s1419_s3 = inlined_call_operand.vmem [shape: f32[1,256], index: 3, kind: input, shape index: {}]   ;;  %s1420_s4 = inlined_call_operand.vmem [shape: bf16[32,128], index: 4, kind: input, shape index: {}]   ;;  %s1421_s5 = inlined_call_operand.vmem [shape: f32[1,128], index: 5, kind: input, shape index: {}]   ;;  %s1422_s6 = inlined_call_operand.hbm [shape: f32[2,1,128], index: 6, kind: output, shape index: {}]  }
   0x1   :  { %13 = vsyncpa [#allocation3 + $0x1], 0  ;;  %s1198_s21 = smov 0   ;;  %s1200_s22 = smov 0  }
   0x2   :  { %s1202_s23 = smov 0   ;;  %s1204_s24 = smov 0  }
   0x3 LB: > { %s1219_s25 = sadd.s32 4294967295, %s1158_s24   ;;  %s850_s26 = sadd.s32 4294967294, %s1158_s24   ;;  %s1158_s24 = sphi %s1204_s24, %s1428_s24   ;;  %s1154_s23 = sphi %s1202_s23, %s1427_s23   ;;  %s1150_s22 = sphi %s1200_s22, %s1426_s22   ;;  %s1146_s21 = sphi %s1198_s21, %s1425_s21  }
   0x4   : > { %s1223_s27 = sadd.s32 1, %s1158_s24   ;;  %s157_s28 = sadd.s32 1, %s1154_s23 }
   0x5   : > { %s154_s29 = ssub.s32 %s1158_s24, %s1223_s27  ;;  %p167_p0 = scmp.ne.s32.totalorder %s1154_s23, %s1150_s22 }
   0x6   : > { %p155_p1 = scmp.eq.s32.totalorder %s154_s29, 0  ;;  %p168_p2 = scmp.eq.s32.totalorder %s1219_s25, 1 }
   0x7   : > { %p173_p3 = scmp.ne.s32.totalorder %s1150_s22, %s1146_s21  ;;  %p174_p4 = scmp.eq.s32.totalorder %s850_s26, 1 }
   0x8   : > { %s1234_s30 = scalar_select %p155_p1, %s1154_s23, %s157_s28  }
   0x9   : > { %p1236_p5 = por %p168_p2, %p167_p0  ;;  %p1240_p6 = por %p174_p4, %p173_p3 }
   0xa   : > { %p853_p7 = scmp.ge.s32.totalorder %s1158_s24, 1  ;;  %p216_p8 = scmp.lt.s32.totalorder %s1158_s24, 3 }
   0xc   : > { %p217_p9 = pnand %p853_p7, %p216_p8 }
   0xd   : > { %v1075_v0 = vld [vmem:[%s1417_s1] sm:$0xff] (!%p217_p9)   ;;  %v1076_v1 = vld [vmem:[%s1417_s1 + $0x8] sm:$0xff] (!%p217_p9)   ;;  %s854_s13 = sshll.u32 (!%p217_p9), %s1219_s25, 5  ;;  %v1077_v2 = vld [vmem:[%s1417_s1 + $0x10] ss:$0 sps:$4 sm:$0x33] (!%p217_p9)   ;;  %v639_v20 = vlaneseq (!%p217_p9) }
   0xe   : > { %220 = sbr.rel (%p217_p9) target bundleno = 756 (0x2f4), region = 44  ;;  %955 = vmatprep.subr.bf16.mxu0 (!%p217_p9), %v1075_v0  ;;  %p246_p10 = scmp.lt.s32.totalorder (!%p217_p9), %s854_s13, 63  ;;  %vm440_vm0 = vcmask (!%p217_p9), 1041408   ;;  %vm391_vm1 = vcmask (!%p217_p9), 293888   ;;  %v637_v23 = vld [vmem:[%s1419_s3] sm:$0x3] (!%p217_p9) }
   0xf   : > { %956 = vmatpush3.bf16.msra.mxu0 (!%p217_p9), %v1075_v0  ;;  %v442_v3 = vsel (!%p217_p9), %vm440_vm0, %v1077_v2, 0  ;;  %v640_v21 = vshrl.u32 (!%p217_p9), %v639_v20, 7  ;;  %v1301_v27 = vld [vmem:[%s1418_s2] ss:$0 sm:$0xff] (!%p217_p9)  ;;  %vm1161_vm2 = vmmov (!%p217_p9), 0   ;;  %vm737_vm3 = vcmask (!%p217_p9), 261120  }
  0x10   : > { %957 = vmatprep.subr.bf16.mxu0 (!%p217_p9), %v1076_v1  ;;  %s1162_s29 = smov (!%p217_p9), [#allocation2]  }
  0x11   : > { %v645_v22 = vsub.s32 (!%p217_p9), 1, %v640_v21  ;;  %v641_v24 = vsub.s32 (!%p217_p9), 0, %v640_v21  ;;  %s1100_s9 = sshll.u32 (!%p217_p9), %s1162_s29, 4  ;;  %s1101_s9 = int_to_ptr.vmem [resolvable:$false] %s1100_s9 }
  0x12   : > { %s1102_s10 = scalar_lea.vmem (!%p217_p9), %s1101_s9, 32 }
  0x13   : > { %958 = vmatpush3.bf16.msra.mxu0 (!%p217_p9), %v1076_v1  ;;  %v646_v25 = vrot.slane (!%p217_p9), %v637_v23, %v645_v22  ;;  %v1296_v26 = vrot.slane (!%p217_p9), %v637_v23, %v641_v24 }
  0x14   : > { %1033 = vmatprep.subr.msk.bf16.mxu0 (!%p217_p9), %vm440_vm0, %v1077_v2 }
  0x15   : > { %s1430_s13 = smov (!%p246_p10, %s854_s13), 63  ;;  %713 = vmatprep.mubr.f32.mxu1 %v646_v25 }
  0x16   : > { %s855_s16 = sshll.u32 %s1430_s13, 2  ;;  %s243_s13 = sand.u32 1, %s1150_s22  }
  0x17   : > { %s1259_s19 = scalar_lea.vmem %s1416_s0, %s855_s16  ;;  %960 = vmatpush3.bf16.msra.mxu0 %v442_v3  ;;  %s895_s16 = sshll.u32 %s1219_s25, 4 }
  0x18   : > { %v1078_v4 = vld [vmem:[%s1259_s19] sm:$0xff]   ;;  %v1079_v5 = vld [vmem:[%s1259_s19 + $0x8] sm:$0xff]   ;;  %v1080_v6 = vld [vmem:[%s1259_s19 + $0x10] sm:$0xff]   ;;  %s244_s17 = scalar_lea.vmem [#allocation2], %s243_s13  ;;  %s1374_s26 = scalar_lea.hbm %s1422_s6, %s895_s16 }
  0x19   : > { %961 = vmatprep.mubr.msk.bf16.mxu0 %vm391_vm1, %v1078_v4  ;;  %v1081_v7 = vld [vmem:[%s1259_s19 + $0x18] sm:$0xff]   ;;  %v1082_v8 = vld [vmem:[%s1259_s19 + $0x20] sm:$0xff]   ;;  %v1083_v9 = vld [vmem:[%s1259_s19 + $0x28] sm:$0xff]   ;;  %s795_s18 = sshll.u32 %s244_s17, 4  ;;  %s783_s28 = scalar_lea.sflag [#allocation3], %s243_s13  ;;  %s1376_s18 = int_to_ptr.vmem [resolvable:$true] %s795_s18 }
  0x1a   : > { %962 = vmatmul.mubr.msk.bf16.vlgmr.msra.gmra.mrb[0].mxu0 %vm391_vm1, %v1079_v5  ;;  %v1084_v10 = vld [vmem:[%s1259_s19 + $0x30] sm:$0xff]   ;;  %v1085_v11 = vld [vmem:[%s1259_s19 + $0x38] sm:$0xff]   ;;  %v1086_v12 = vld [vmem:[%s1259_s19 + $0x40] sm:$0xff]   ;;  %s1096_s25 = scalar_lea.vmem %s1376_s18, 16  ;;  %p1103_p0 = scmp.lt.s32.totalorder %s1376_s18, %s1101_s9 }
  0x1b   : > { %965 = vmatprep.mubr.msk.bf16.mxu0 %vm391_vm1, %v1080_v6  ;;  %v1087_v13 = vld [vmem:[%s1259_s19 + $0x48] sm:$0xff]   ;;  %v1088_v14 = vld [vmem:[%s1259_s19 + $0x50] sm:$0xff]   ;;  %v1089_v15 = vld [vmem:[%s1259_s19 + $0x58] sm:$0xff]   ;;  %p1097_p11 = scmp.ne.s32.totalorder %s1376_s18, %s1096_s25  ;;  %p1104_p1 = scmp.lt.s32.totalorder %s1102_s10, %s1096_s25 }
  0x1c   : > { %v1090_v16 = vld [vmem:[%s1259_s19 + $0x60] sm:$0xff]   ;;  %v1091_v17 = vld [vmem:[%s1259_s19 + $0x68] sm:$0xff]   ;;  %v1092_v18 = vld [vmem:[%s1259_s19 + $0x70] sm:$0xff]  }
  0x1d   : > { %v1093_v19 = vld [vmem:[%s1259_s19 + $0x78] sm:$0xff]   ;;  %p1098_p12 = pnand %p1097_p11, %p1236_p5  ;;  %p1105_p2 = por %p1104_p1, %p1103_p0 }
  0x1f   : > { %p1099_p13 = pneg %p1098_p12 }
  0x21   : > { %p1106_p3 = pnand %p1105_p2, %p1099_p13 }
  0x22   : > { %966 = vmatmul.mubr.msk.bf16.gmra.mrb[4].mxu0 %vm391_vm1, %v1081_v7 }
  0x23   : > { %969 = vmatprep.mubr.msk.bf16.mxu0 %vm391_vm1, %v1082_v8 }
  0x2a   : > { %970 = vmatmul.mubr.msk.bf16.gmra.mrb[8].mxu0 %vm391_vm1, %v1083_v9 }
  0x2b   : > { %973 = vmatprep.mubr.msk.bf16.mxu0 %vm391_vm1, %v1084_v10 }
  0x32   : > { %974 = vmatmul.mubr.msk.bf16.gmra.mrb[12].mxu0 %vm391_vm1, %v1085_v11 }
  0x33   : > { %977 = vmatprep.mubr.msk.bf16.mxu0 %vm391_vm1, %v1086_v12 }
  0x3a   : > { %978 = vmatmul.mubr.msk.bf16.gmra.mrb[16].mxu0 %vm391_vm1, %v1087_v13 }
  0x3b   : > { %981 = vmatprep.mubr.msk.bf16.mxu0 %vm391_vm1, %v1088_v14 }
  0x42   : > { %982 = vmatmul.mubr.msk.bf16.gmra.mrb[20].mxu0 %vm391_vm1, %v1089_v15 }
  0x43   : > { %985 = vmatprep.mubr.msk.bf16.mxu0 %vm391_vm1, %v1090_v16 }
  0x4a   : > { %986 = vmatmul.mubr.msk.bf16.gmra.mrb[24].mxu0 %vm391_vm1, %v1091_v17 }
  0x4b   : > { %989 = vmatprep.mubr.msk.bf16.mxu0 %vm391_vm1, %v1092_v18 }
  0x52   : > { %990 = vmatmul.mubr.msk.bf16.gmra.mrb[28].mxu0 %vm391_vm1, %v1093_v19 }
  0xed   : > { %v963_v28 = vpop.f32.mrb[0].mxu0 }
  0xee   : > { %v487_v29 = vadd.f32 %v963_v28, %v1301_v27  ;;  %v478_v30 = vpop.f32.mrb[1].mxu0 }
  0xef   : > { %v479_v31 = vadd.f32 %v1301_v27, %v478_v30  ;;  %v964_v32 = vpop.f32.mrb[2].mxu0 }
  0xf0   : > { %v490_v33 = vadd.f32 %v964_v32, %v1301_v27  ;;  %v481_v34 = vpop.f32.mrb[3].mxu0  ;;  %v607_v36 = vmax.f32 %v487_v29, 0.0 }
  0xf1   : > { %v482_v35 = vadd.f32 %v1301_v27, %v481_v34  ;;  %v605_v38 = vmax.f32 %v479_v31, 0.0 }
  0xf2   : > { %v608_v37 = vmax.f32 %v490_v33, 0.0 }
  0xf3   : > { %v606_v39 = vmax.f32 %v482_v35, 0.0 }
  0xf4   : > { %v1307_v40 = vpack.c.bf16 %v608_v37, %v607_v36 }
  0xf5   : > { %v967_v41 = vpop.f32.mrb[4].mxu0  ;;  %v1309_v42 = vpack.c.bf16 %v606_v39, %v605_v38 }
  0xf6   : > { %v503_v43 = vadd.f32 %v967_v41, %v1301_v27  ;;  %v494_v44 = vpop.f32.mrb[5].mxu0 }
  0xf7   : > { %v495_v45 = vadd.f32 %v1301_v27, %v494_v44  ;;  %v968_v46 = vpop.f32.mrb[6].mxu0 }
  0xf8   : > { %v506_v47 = vadd.f32 %v968_v46, %v1301_v27  ;;  %v497_v48 = vpop.f32.mrb[7].mxu0  ;;  %v611_v50 = vmax.f32 %v503_v43, 0.0 }
  0xf9   : > { %v498_v49 = vadd.f32 %v1301_v27, %v497_v48  ;;  %v609_v52 = vmax.f32 %v495_v45, 0.0 }
  0xfa   : > { %v612_v51 = vmax.f32 %v506_v47, 0.0 }
  0xfb   : > { %v610_v53 = vmax.f32 %v498_v49, 0.0 }
  0xfc   : > { %v1315_v54 = vpack.c.bf16 %v612_v51, %v611_v50 }
  0xfd   : > { %v1317_v55 = vpack.c.bf16 %v610_v53, %v609_v52  ;;  %v971_v56 = vpop.f32.mrb[8].mxu0 }
  0xfe   : > { %v519_v57 = vadd.f32 %v971_v56, %v1301_v27  ;;  %v510_v58 = vpop.f32.mrb[9].mxu0 }
  0xff   : > { %v511_v59 = vadd.f32 %v1301_v27, %v510_v58  ;;  %v972_v60 = vpop.f32.mrb[10].mxu0 }
 0x100   : > { %v522_v61 = vadd.f32 %v972_v60, %v1301_v27  ;;  %v513_v62 = vpop.f32.mrb[11].mxu0  ;;  %v615_v0 = vmax.f32 %v519_v57, 0.0 }
 0x101   : > { %v514_v63 = vadd.f32 %v1301_v27, %v513_v62  ;;  %v613_v2 = vmax.f32 %v511_v59, 0.0 }
 0x102   : > { %v616_v1 = vmax.f32 %v522_v61, 0.0 }
 0x103   : > { %v614_v3 = vmax.f32 %v514_v63, 0.0 }
 0x104   : > { %v1323_v4 = vpack.c.bf16 %v616_v1, %v615_v0 }
 0x105   : > { %v1325_v5 = vpack.c.bf16 %v614_v3, %v613_v2  ;;  %v975_v6 = vpop.f32.mrb[12].mxu0 }
 0x106   : > { %v535_v7 = vadd.f32 %v975_v6, %v1301_v27  ;;  %v526_v8 = vpop.f32.mrb[13].mxu0 }
 0x107   : > { %v527_v9 = vadd.f32 %v1301_v27, %v526_v8  ;;  %v976_v10 = vpop.f32.mrb[14].mxu0 }
 0x108   : > { %v538_v11 = vadd.f32 %v976_v10, %v1301_v27  ;;  %v529_v12 = vpop.f32.mrb[15].mxu0  ;;  %v619_v14 = vmax.f32 %v535_v7, 0.0 }
 0x109   : > { %v530_v13 = vadd.f32 %v1301_v27, %v529_v12  ;;  %v617_v16 = vmax.f32 %v527_v9, 0.0 }
 0x10a   : > { %v620_v15 = vmax.f32 %v538_v11, 0.0 }
 0x10b   : > { %v618_v17 = vmax.f32 %v530_v13, 0.0 }
 0x10c   : > { %v1331_v18 = vpack.c.bf16 %v620_v15, %v619_v14 }
 0x10d   : > { %v1333_v19 = vpack.c.bf16 %v618_v17, %v617_v16  ;;  %v979_v20 = vpop.f32.mrb[16].mxu0 }
 0x10e   : > { %v551_v21 = vadd.f32 %v979_v20, %v1301_v27  ;;  %v542_v22 = vpop.f32.mrb[17].mxu0 }
 0x10f   : > { %v543_v23 = vadd.f32 %v1301_v27, %v542_v22  ;;  %v980_v24 = vpop.f32.mrb[18].mxu0 }
 0x110   : > { %v554_v25 = vadd.f32 %v980_v24, %v1301_v27  ;;  %v545_v28 = vpop.f32.mrb[19].mxu0  ;;  %v623_v30 = vmax.f32 %v551_v21, 0.0 }
 0x111   : > { %v546_v29 = vadd.f32 %v1301_v27, %v545_v28  ;;  %v621_v32 = vmax.f32 %v543_v23, 0.0 }
 0x112   : > { %v624_v31 = vmax.f32 %v554_v25, 0.0 }
 0x113   : > { %v622_v33 = vmax.f32 %v546_v29, 0.0 }
 0x114   : > { %v1005_v34 = vpack.c.bf16 %v624_v31, %v623_v30 }
 0x115   : > { %v983_v35 = vpop.f32.mrb[20].mxu0  ;;  %v1001_v36 = vpack.c.bf16 %v622_v33, %v621_v32 }
 0x116   : > { %v567_v37 = vadd.f32 %v983_v35, %v1301_v27  ;;  %v558_v38 = vpop.f32.mrb[21].mxu0 }
 0x117   : > { %v559_v39 = vadd.f32 %v1301_v27, %v558_v38  ;;  %v984_v41 = vpop.f32.mrb[22].mxu0  ;;  %1002 = vmatprep.subr.bf16.mxu1 %v1001_v36 }
 0x118   : > { %v570_v43 = vadd.f32 %v984_v41, %v1301_v27  ;;  %v561_v44 = vpop.f32.mrb[23].mxu0  ;;  %1004 = vmatpush3.bf16.msra.mxu1 %v1309_v42  ;;  %v627_v46 = vmax.f32 %v567_v37, 0.0 }
 0x119   : > { %v562_v45 = vadd.f32 %v1301_v27, %v561_v44  ;;  %1006 = vmatprep.subr.bf16.mxu1 %v1005_v34  ;;  %v625_v48 = vmax.f32 %v559_v39, 0.0 }
 0x11a   : > { %v628_v47 = vmax.f32 %v570_v43, 0.0 }
 0x11b   : > { %v626_v49 = vmax.f32 %v562_v45, 0.0 }
 0x11c   : > { %v1013_v50 = vpack.c.bf16 %v628_v47, %v627_v46  ;;  %1008 = vmatpush3.bf16.msra.mxu1 %v1307_v40 }
 0x11d   : > { %v1009_v51 = vpack.c.bf16 %v626_v49, %v625_v48  ;;  %v987_v52 = vpop.f32.mrb[24].mxu0 }
 0x11e   : > { %v583_v53 = vadd.f32 %v987_v52, %v1301_v27  ;;  %v574_v56 = vpop.f32.mrb[25].mxu0 }
 0x11f   : > { %v575_v57 = vadd.f32 %v1301_v27, %v574_v56  ;;  %v988_v58 = vpop.f32.mrb[26].mxu0  ;;  %1010 = vmatprep.subr.bf16.mxu1 %v1009_v51 }
 0x120   : > { %v586_v42 = vadd.f32 %v988_v58, %v1301_v27  ;;  %v577_v59 = vpop.f32.mrb[27].mxu0  ;;  %1012 = vmatpush3.bf16.msra.mxu1 %v1317_v55  ;;  %v631_v61 = vmax.f32 %v583_v53, 0.0 }
 0x121   : > { %v578_v60 = vadd.f32 %v1301_v27, %v577_v59  ;;  %1014 = vmatprep.subr.bf16.mxu1 %v1013_v50  ;;  %v629_v40 = vmax.f32 %v575_v57, 0.0 }
 0x122   : > { %v632_v62 = vmax.f32 %v586_v42, 0.0 }
 0x123   : > { %v630_v63 = vmax.f32 %v578_v60, 0.0 }
 0x124   : > { %v1021_v0 = vpack.c.bf16 %v632_v62, %v631_v61  ;;  %1016 = vmatpush3.bf16.msra.mxu1 %v1315_v54 }
 0x125   : > { %v1017_v1 = vpack.c.bf16 %v630_v63, %v629_v40  ;;  %v991_v2 = vpop.f32.mrb[28].mxu0 }
 0x126   : > { %v599_v3 = vadd.f32 %v991_v2, %v1301_v27  ;;  %v590_v6 = vpop.f32.mrb[29].mxu0 }
 0x127   : > { %v591_v7 = vadd.f32 %v1301_v27, %v590_v6  ;;  %v992_v8 = vpop.f32.mrb[30].mxu0  ;;  %1018 = vmatprep.subr.bf16.mxu1 %v1017_v1 }
 0x128   : > { %v602_v55 = vadd.f32 %v992_v8, %v1301_v27  ;;  %v593_v9 = vpop.f32.mrb[31].mxu0  ;;  %1020 = vmatpush3.bf16.msra.mxu1 %v1325_v5  ;;  %v635_v11 = vmax.f32 %v599_v3, 0.0  ;;  %v1094_v5 = vld [vmem:[%s1420_s4] sm:$0xff]  }
 0x129   : > { %v594_v10 = vadd.f32 %v1301_v27, %v593_v9  ;;  %1022 = vmatprep.subr.bf16.mxu1 %v1021_v0  ;;  %v633_v54 = vmax.f32 %v591_v7, 0.0  ;;  %v1160_v27 = vmov 0.0  }
 0x12a   : > { %v636_v12 = vmax.f32 %v602_v55, 0.0 }
 0x12b   : > { %v634_v13 = vmax.f32 %v594_v10, 0.0 }
 0x12c   : > { %v1029_v14 = vpack.c.bf16 %v636_v12, %v635_v11  ;;  %1024 = vmatpush3.bf16.msra.mxu1 %v1323_v4  ;;  %v1095_v4 = vld [vmem:[%s1420_s4 + $0x8] sm:$0xff]  }
 0x12d   : > { %v1025_v15 = vpack.c.bf16 %v634_v13, %v633_v54 }
 0x12f   : > { %1026 = vmatprep.subr.bf16.mxu1 %v1025_v15 }
 0x130   : > { %1028 = vmatpush3.bf16.msra.mxu1 %v1333_v19 }
 0x131   : > { %1030 = vmatprep.subr.bf16.mxu1 %v1029_v14 }
 0x134   : > { %1032 = vmatpush3.bf16.msra.mxu1 %v1331_v18 }
 0x135   : > { %993 = vmatprep.subr.bf16.mxu1 %v1160_v27 }
 0x137   : > { %714 = vmatmul.mubr.f32.vlgmr.msra.gmra.mrb[0].mxu1 %v1296_v26  ;;  %v724_v26 = vld [vmem:[%s1421_s5] sm:$0x1] }
 0x138   : > { %994 = vmatpush3.bf16.msra.mxu1 %v1094_v5  ;;  %997 = vmatprep.mubr.msk.bf16.mxu1 %vm1161_vm2, %v1160_v27 }
 0x139   : > { %995 = vmatprep.subr.bf16.mxu1 %v1160_v27 }
 0x13c   : > { %996 = vmatpush3.bf16.msra.mxu1 %v1095_v4 }
 0x20a   : > { %v949_v16 = vpop.f32.mrb[0].mxu1 }
 0x20b   : > { %v950_v17 = vpop.f32.mrb[1].mxu1 }
 0x20c   : > { %v951_v18 = vadd.f32 %v950_v17, %v949_v16 }
 0x20e   : > { %v719_v19 = vpack.c.bf16 %v951_v18, %v951_v18 }
 0x210   : > { %998 = vmatmul.mubr.msk.bf16.vlgmr.msra.gmra.mrb[4].mxu1 %vm737_vm3, %v719_v19 }
 0x2e3   : > { %v775_v20 = vpop.f32.mrb[4].mxu1 }
 0x2e4   : > { %v776_v21 = vadd.f32 %v775_v20, %v724_v26  ;;  %v999_v22 = vpop.f32.mrb[5].mxu1 }
 0x2e5   : > { %v778_v23 = vpop.f32.mrb[6].mxu1 }
 0x2e6   : > { %781 = vst [vmem:[%s244_s17] sm:$0x1] %v776_v21  ;;  %v1000_v24 = vpop.f32.mrb[7].mxu1 }
 0x2e7   : > { %1109 = shalt.err (!%p1106_p3)
}
 0x2e8   : > { %s1110_s11 = scalar_lea.hbm %s1374_s26, 16  ;;  %s1114_s14 = scalar_lea.hbm %s1422_s6, 32 }
 0x2e9   : > { %p1111_p4 = scmp.ne.s32.totalorder %s1374_s26, %s1110_s11  ;;  %p1115_p9 = scmp.lt.u32.totalorder %s1374_s26, %s1422_s6 }
 0x2ea   : > { %p1116_p10 = scmp.lt.u32.totalorder %s1114_s14, %s1110_s11  ;;  %p1118_p12 = scmp.lt.u32.totalorder %s1110_s11, %s1374_s26 }
 0x2eb   : > { %p1112_p7 = pnand %p1111_p4, %p1236_p5 }
 0x2ec   : > { %p1117_p11 = por %p1116_p10, %p1115_p9 }
 0x2ed   : > { %p1113_p8 = pneg %p1112_p7 }
 0x2ee   : > { %p1119_p13 = por %p1118_p12, %p1117_p11 }
 0x2f0   : > { %p1120_p0 = pnand %p1119_p13, %p1113_p8 }
 0x2f2   : > { %1123 = shalt.err (!%p1120_p0)
}
 0x2f3   : > { %1034 = dma.vmem_to_hbm [thread:$0]  (%p1236_p5), %s1376_s18, 16, %s1374_s26, %s783_s28  }
 0x2f4 PF: > { %p1040_p1 = scmp.ge.s32.totalorder %s1158_s24, 2  ;;  %s807_s17 = sand.u32 1, %s1146_s21  }
 0x2f5   : > { %s808_s19 = scalar_lea.sflag [#allocation3], %s807_s17 }
 0x2f6   : > { %p1037_p2 = pnand %p1040_p1, %p1240_p6 }
 0x2f8   : > { %1141 = dma.done.wait (!%p1037_p2), %s808_s19, 16  }
 0x2f9   : > { %1143 = vsyncadd (!%p1037_p2), %s808_s19, 4294967280  ;;  %p16_p3 = scmp.ge.s32.totalorder %s1223_s27, 4   ;;  %s1425_s21 = smov %s1150_s22 }
 0x2fa   : > { %s1426_s22 = smov %s1154_s23  ;;  %s1427_s23 = smov %s1234_s30 }
 0x2fb   : > { %s1428_s24 = smov %s1223_s27  ;;  %18 = sbr.rel (!%p16_p3) target bundleno = 3 (0x3), region = 79 }
 0x302   :  { %812 = vsyncpa [#allocation3], 1 }
 0x303   :  { %814 = vsyncpa [#allocation3 + $0x1], 1 }

</bundles_post_ra>
